<compile_context>
chip_gen: v6e
topology: v6e:2x2x1
jax: 0.10.0
libtpu: 0.0.40
codegen_flags: <defaults>
</compile_context>

<pallas_src>
import jax
import jax.numpy as jnp
from jax.experimental import pallas as pl
from jax.experimental.pallas import tpu as pltpu


def _mlp_head_kernel(x_ref, w1_ref, b1_ref, w2_ref, b2_ref, w3_ref, b3_ref, o_ref):
    # One batch tile per grid step; weights/biases are the same resident block
    # every step.  Three MXU matmuls with f32 accumulation; bias-add + ReLU on
    # the VPU in f32; operands re-cast to the (bf16) compute dtype between GEMMs.
    x = x_ref[...]                                                      # [TB, Dp]
    h1 = jnp.dot(x, w1_ref[...], preferred_element_type=jnp.float32)
    h1 = jnp.maximum(h1 + b1_ref[...], 0.0)                             # f32
    h1 = h1.astype(w2_ref.dtype)
    h2 = jnp.dot(h1, w2_ref[...], preferred_element_type=jnp.float32)
    h2 = jnp.maximum(h2 + b2_ref[...], 0.0)                             # f32
    h2 = h2.astype(w3_ref.dtype)
    out = jnp.dot(h2, w3_ref[...], preferred_element_type=jnp.float32) + b3_ref[...]
    o_ref[...] = out.astype(o_ref.dtype)                                # lane-dense [TB, Cp]


def _round_up(v, m):
    return (v + m - 1) // m * m


def _pad2(a, rows, cols, dtype):
    return jnp.pad(a, ((0, rows - a.shape[0]), (0, cols - a.shape[1]))).astype(dtype)


def model_head_forward(x, params, *, compute_dtype=jnp.bfloat16, block_b=512):
    """x: [B, input_dim] float32. params: dict w1,b1,w2,b2,w3,b3 ([in,out] / [1,out])."""
    w1, b1, w2, b2, w3, b3 = (params[k] for k in ("w1", "b1", "w2", "b2", "w3", "b3"))
    B, Din = x.shape
    H, H2, C = w1.shape[1], w2.shape[1], w3.shape[1]

    # Lane-dense padded sizes (multiples of 128 on the feature axes).
    Dp, Hp, H2p, Cp = (_round_up(d, 128) for d in (Din, H, H2, C))
    TB = min(block_b, _round_up(B, 8))          # batch tile (multiple of 8 sublanes)
    Bp = _round_up(B, TB)

    xp = _pad2(x, Bp, Dp, compute_dtype)
    w1p = _pad2(w1, Dp, Hp, compute_dtype)
    w2p = _pad2(w2, Hp, H2p, compute_dtype)
    w3p = _pad2(w3, H2p, Cp, compute_dtype)
    b1p = _pad2(b1, 1, Hp, jnp.float32)
    b2p = _pad2(b2, 1, H2p, jnp.float32)
    b3p = _pad2(b3, 1, Cp, jnp.float32)

    # VMEM budget: resident weights/biases + double-buffered x/out tiles +
    # f32 intermediates; keep comfortably under v7x's 64 MiB physical VMEM.
    cdb = jnp.dtype(compute_dtype).itemsize
    resident_bytes = cdb * (Dp * Hp + Hp * H2p + H2p * Cp) + 4 * (Hp + H2p + Cp)
    tile_bytes = 2 * cdb * TB * Dp + 2 * 4 * TB * Cp + 4 * TB * (Hp + H2p)
    vmem_limit = min(int(1.5 * (resident_bytes + tile_bytes)) + (4 << 20), 56 << 20)

    def _resident(shape):
        return pl.BlockSpec(shape, lambda i: (0, 0))

    grid = (pl.cdiv(Bp, TB),)
    out = pl.pallas_call(
        _mlp_head_kernel,
        out_shape=jax.ShapeDtypeStruct((Bp, Cp), jnp.float32),
        grid_spec=pltpu.PrefetchScalarGridSpec(
            num_scalar_prefetch=0,
            grid=grid,
            in_specs=[
                pl.BlockSpec((TB, Dp), lambda i: (i, 0)),   # streamed batch tile
                _resident((Dp, Hp)), _resident((1, Hp)),    # fc1 (resident)
                _resident((Hp, H2p)), _resident((1, H2p)),  # fc2 (resident)
                _resident((H2p, Cp)), _resident((1, Cp)),   # fc3 (resident)
            ],
            out_specs=pl.BlockSpec((TB, Cp), lambda i: (i, 0)),
        ),
        compiler_params=pltpu.CompilerParams(
            dimension_semantics=("parallel",),              # megacore on v7x
            vmem_limit_bytes=vmem_limit,
        ),
    )(xp, w1p, b1p, w2p, b2p, w3p, b3p)

    return out[:B, :C].astype(x.dtype)


def init_params(key, input_dim, hidden_dim, n_classes):
    """Deterministic synthetic init (PyTorch-Linear-like uniform bounds)."""
    keys = jax.random.split(key, 6)

    def linear(kw, kb, fan_in, fan_out):
        bound = 1.0 / jnp.sqrt(jnp.float32(fan_in))
        w = jax.random.uniform(kw, (fan_in, fan_out), jnp.float32, -bound, bound)
        b = jax.random.uniform(kb, (1, fan_out), jnp.float32, -bound, bound)
        return w, b

    w1, b1 = linear(keys[0], keys[1], input_dim, hidden_dim)
    w2, b2 = linear(keys[2], keys[3], hidden_dim, hidden_dim // 2)
    w3, b3 = linear(keys[4], keys[5], hidden_dim // 2, n_classes)
    return {"w1": w1, "b1": b1, "w2": w2, "b2": b2, "w3": w3, "b3": b3}


def _reference_f32(x, p):
    h1 = jnp.maximum(x @ p["w1"] + p["b1"], 0.0)
    h2 = jnp.maximum(h1 @ p["w2"] + p["b2"], 0.0)
    return h2 @ p["w3"] + p["b3"]


if __name__ == "__main__":
    key = jax.random.PRNGKey(0)
    k_x, k_p = jax.random.split(key)

    batch, input_dim, hidden_dim, n_classes = 24, 32, 32, 8
    x = jax.random.normal(k_x, (batch, input_dim), jnp.float32)
    params = init_params(k_p, input_dim, hidden_dim, n_classes)
    ref = _reference_f32(x, params)

    # bf16-operand path (block_b=8 -> 3 grid steps, exercises the pipeline).
    out_bf16 = jax.block_until_ready(
        model_head_forward(x, params, compute_dtype=jnp.bfloat16, block_b=8))
    assert out_bf16.shape == (batch, n_classes)
    assert jnp.allclose(out_bf16, ref, atol=1e-1, rtol=1e-1), "bf16 path mismatch"

    # f32 fallback path for a tight numerical check.
    out_f32 = jax.block_until_ready(
        model_head_forward(x, params, compute_dtype=jnp.float32, block_b=8))
    assert jnp.allclose(out_f32, ref, atol=1e-3, rtol=1e-3), "f32 path mismatch"

    print("KERNEL_OK")
</pallas_src>

<mosaic_0001>
module attributes {stable_mosaic.version = 11 : i64} {
  func.func @_mlp_head_kernel(%arg0: i32, %arg1: memref<8x128xbf16, #tpu.memory_space<vmem>>, %arg2: memref<128x128xbf16, #tpu.memory_space<vmem>>, %arg3: memref<1x128xf32, #tpu.memory_space<vmem>>, %arg4: memref<128x128xbf16, #tpu.memory_space<vmem>>, %arg5: memref<1x128xf32, #tpu.memory_space<vmem>>, %arg6: memref<128x128xbf16, #tpu.memory_space<vmem>>, %arg7: memref<1x128xf32, #tpu.memory_space<vmem>>, %arg8: memref<8x128xf32, #tpu.memory_space<vmem>>) attributes {dimension_semantics = [#tpu.dimension_semantics<parallel>], iteration_bounds = array<i64: 3>, scalar_prefetch = 0 : i64, scratch_operands = 0 : i64, tpu.core_type = #tpu.core_type<tc>, window_params = [{transform_indices = @transform_0, window_bounds = array<i64: 8, 128>}, {pipeline_mode = #tpu.pipeline_mode<synchronous>, transform_indices = @transform_1, window_bounds = array<i64: 128, 128>}, {pipeline_mode = #tpu.pipeline_mode<synchronous>, transform_indices = @transform_2, window_bounds = array<i64: 1, 128>}, {pipeline_mode = #tpu.pipeline_mode<synchronous>, transform_indices = @transform_3, window_bounds = array<i64: 128, 128>}, {pipeline_mode = #tpu.pipeline_mode<synchronous>, transform_indices = @transform_4, window_bounds = array<i64: 1, 128>}, {pipeline_mode = #tpu.pipeline_mode<synchronous>, transform_indices = @transform_5, window_bounds = array<i64: 128, 128>}, {pipeline_mode = #tpu.pipeline_mode<synchronous>, transform_indices = @transform_6, window_bounds = array<i64: 1, 128>}, {transform_indices = @transform_7, window_bounds = array<i64: 8, 128>}]} {
    %c0 = arith.constant 0 : index
    %c0_0 = arith.constant 0 : index
    %0 = vector.load %arg1[%c0, %c0_0] : memref<8x128xbf16, #tpu.memory_space<vmem>>, vector<8x128xbf16>
    %c0_1 = arith.constant 0 : index
    %c0_2 = arith.constant 0 : index
    %1 = vector.load %arg2[%c0_1, %c0_2] : memref<128x128xbf16, #tpu.memory_space<vmem>>, vector<128x128xbf16>
    %cst = arith.constant dense<0.000000e+00> : vector<8x128xf32>
    %2 = tpu.matmul %0, %1, %cst {dimension_numbers = #tpu.dot_dimension_numbers<[1], [0], [0], [1], [0, 0, 1, 1], [], []>} : vector<8x128xbf16>, vector<128x128xbf16>, vector<8x128xf32> -> vector<8x128xf32>
    %c0_3 = arith.constant 0 : index
    %c0_4 = arith.constant 0 : index
    %3 = vector.load %arg3[%c0_3, %c0_4] : memref<1x128xf32, #tpu.memory_space<vmem>>, vector<1x128xf32>
    %4 = vector.broadcast %3 : vector<1x128xf32> to vector<8x128xf32>
    %5 = arith.addf %2, %4 : vector<8x128xf32>
    %cst_5 = arith.constant 0.000000e+00 : f32
    %6 = vector.broadcast %cst_5 : f32 to vector<8x128xf32>
    %7 = arith.maximumf %5, %6 : vector<8x128xf32>
    %8 = arith.truncf %7 : vector<8x128xf32> to vector<8x128xbf16>
    %c0_6 = arith.constant 0 : index
    %c0_7 = arith.constant 0 : index
    %9 = vector.load %arg4[%c0_6, %c0_7] : memref<128x128xbf16, #tpu.memory_space<vmem>>, vector<128x128xbf16>
    %cst_8 = arith.constant dense<0.000000e+00> : vector<8x128xf32>
    %10 = tpu.matmul %8, %9, %cst_8 {dimension_numbers = #tpu.dot_dimension_numbers<[1], [0], [0], [1], [0, 0, 1, 1], [], []>} : vector<8x128xbf16>, vector<128x128xbf16>, vector<8x128xf32> -> vector<8x128xf32>
    %c0_9 = arith.constant 0 : index
    %c0_10 = arith.constant 0 : index
    %11 = vector.load %arg5[%c0_9, %c0_10] : memref<1x128xf32, #tpu.memory_space<vmem>>, vector<1x128xf32>
    %12 = vector.broadcast %11 : vector<1x128xf32> to vector<8x128xf32>
    %13 = arith.addf %10, %12 : vector<8x128xf32>
    %cst_11 = arith.constant 0.000000e+00 : f32
    %14 = vector.broadcast %cst_11 : f32 to vector<8x128xf32>
    %15 = arith.maximumf %13, %14 : vector<8x128xf32>
    %16 = arith.truncf %15 : vector<8x128xf32> to vector<8x128xbf16>
    %c0_12 = arith.constant 0 : index
    %c0_13 = arith.constant 0 : index
    %17 = vector.load %arg6[%c0_12, %c0_13] : memref<128x128xbf16, #tpu.memory_space<vmem>>, vector<128x128xbf16>
    %cst_14 = arith.constant dense<0.000000e+00> : vector<8x128xf32>
    %18 = tpu.matmul %16, %17, %cst_14 {dimension_numbers = #tpu.dot_dimension_numbers<[1], [0], [0], [1], [0, 0, 1, 1], [], []>} : vector<8x128xbf16>, vector<128x128xbf16>, vector<8x128xf32> -> vector<8x128xf32>
    %c0_15 = arith.constant 0 : index
    %c0_16 = arith.constant 0 : index
    %19 = vector.load %arg7[%c0_15, %c0_16] : memref<1x128xf32, #tpu.memory_space<vmem>>, vector<1x128xf32>
    %20 = vector.broadcast %19 : vector<1x128xf32> to vector<8x128xf32>
    %21 = arith.addf %18, %20 : vector<8x128xf32>
    %c0_17 = arith.constant 0 : index
    %c0_18 = arith.constant 0 : index
    %22 = vector.load %arg8[%c0_17, %c0_18] : memref<8x128xf32, #tpu.memory_space<vmem>>, vector<8x128xf32>
    tpu.vector_store %arg8[%c0_17, %c0_18], %21 {strides = array<i32>} : memref<8x128xf32, #tpu.memory_space<vmem>>, vector<8x128xf32>,
    return
  }
  func.func @transform_0(%arg0: i32) -> (i32, i32) {
    %c0_i32 = arith.constant 0 : i32
    %c0_i32_0 = arith.constant 0 : i32
    return %arg0, %c0_i32 : i32, i32
  }
  func.func @transform_1(%arg0: i32) -> (i32, i32) {
    %c0_i32 = arith.constant 0 : i32
    %c0_i32_0 = arith.constant 0 : i32
    %c0_i32_1 = arith.constant 0 : i32
    return %c0_i32, %c0_i32_0 : i32, i32
  }
  func.func @transform_2(%arg0: i32) -> (i32, i32) {
    %c0_i32 = arith.constant 0 : i32
    %c0_i32_0 = arith.constant 0 : i32
    %c0_i32_1 = arith.constant 0 : i32
    return %c0_i32, %c0_i32_0 : i32, i32
  }
  func.func @transform_3(%arg0: i32) -> (i32, i32) {
    %c0_i32 = arith.constant 0 : i32
    %c0_i32_0 = arith.constant 0 : i32
    %c0_i32_1 = arith.constant 0 : i32
    return %c0_i32, %c0_i32_0 : i32, i32
  }
  func.func @transform_4(%arg0: i32) -> (i32, i32) {
    %c0_i32 = arith.constant 0 : i32
    %c0_i32_0 = arith.constant 0 : i32
    %c0_i32_1 = arith.constant 0 : i32
    return %c0_i32, %c0_i32_0 : i32, i32
  }
  func.func @transform_5(%arg0: i32) -> (i32, i32) {
    %c0_i32 = arith.constant 0 : i32
    %c0_i32_0 = arith.constant 0 : i32
    %c0_i32_1 = arith.constant 0 : i32
    return %c0_i32, %c0_i32_0 : i32, i32
  }
  func.func @transform_6(%arg0: i32) -> (i32, i32) {
    %c0_i32 = arith.constant 0 : i32
    %c0_i32_0 = arith.constant 0 : i32
    %c0_i32_1 = arith.constant 0 : i32
    return %c0_i32, %c0_i32_0 : i32, i32
  }
  func.func @transform_7(%arg0: i32) -> (i32, i32) {
    %c0_i32 = arith.constant 0 : i32
    %c0_i32_0 = arith.constant 0 : i32
    return %arg0, %c0_i32 : i32, i32
  }
}

</mosaic_0001>

<bundles_post_ra>
// kernel: tpu_custom_call.1
= control target key start
LH: loop header
LB: loop body
LE: loop exit
PB: predicated region body
PF: predicated region fallthrough
CT: control target
= control target key end

     0   :  { %s1487_s0 = inlined_call_operand.hbm [shape: bf16[24,128], index: 0, kind: input, shape index: {}]   ;;  %s1488_s1 = inlined_call_operand.hbm [shape: bf16[128,128], index: 1, kind: input, shape index: {}]   ;;  %s1489_s2 = inlined_call_operand.vmem [shape: f32[1,128], index: 2, kind: input, shape index: {}]   ;;  %s1490_s3 = inlined_call_operand.hbm [shape: bf16[128,128], index: 3, kind: input, shape index: {}]   ;;  %s1491_s4 = inlined_call_operand.vmem [shape: f32[1,128], index: 4, kind: input, shape index: {}]   ;;  %s1492_s5 = inlined_call_operand.hbm [shape: bf16[128,128], index: 5, kind: input, shape index: {}]   ;;  %s1493_s6 = inlined_call_operand.vmem [shape: f32[1,128], index: 6, kind: input, shape index: {}]   ;;  %s1494_s7 = inlined_call_operand.hbm [shape: f32[24,128], index: 7, kind: output, shape index: {}]  }
   0x1   :  { %1499 = sst [smem:[#allocation15_spill]] %s1488_s1 }
   0x2   :  { %1500 = sst [smem:[#allocation16_spill]] %s1490_s3 }
   0x3   :  { %12 = vsyncpa [#allocation3], 0 }
   0x4   :  { %14 = vsyncpa [#allocation3 + $0x1], 0 }
   0x5   :  { %15 = vsyncpa [#allocation6], 0 }
   0x6   :  { %16 = vsyncpa [#allocation9], 0 }
   0x7   :  { %17 = vsyncpa [#allocation4], 0 }
   0x8   :  { %19 = vsyncpa [#allocation4 + $0x1], 0  ;;  %s1257_s24 = smov 0   ;;  %s1259_s25 = smov 0  }
   0x9   :  { %s1261_s26 = smov 0   ;;  %s1263_s27 = smov 0  }
   0xa LB: > { %s1278_s28 = sadd.s32 4294967295, %s1206_s27   ;;  %s791_s29 = sadd.s32 4294967294, %s1206_s27   ;;  %s1206_s27 = sphi %s1263_s27, %s1521_s27   ;;  %s1202_s26 = sphi %s1261_s26, %s1520_s26   ;;  %s1198_s25 = sphi %s1259_s25, %s1519_s25   ;;  %s1194_s24 = sphi %s1257_s24, %s1518_s24  }
   0xb   : > { %p45_p0 = scmp.ne.s32.totalorder %s1198_s25, %s1194_s24  ;;  %p1495_p1 = scmp.eq.s32.totalorder %s1278_s28, 0 }
   0xc   : > { %p201_p3 = scmp.eq.s32.totalorder %s791_s29, 2  ;;  %p792_p5 = scmp.ge.s32.totalorder %s1206_s27, 1 }
   0xd   : > { %p1287_p4 = por %p1495_p1, %p45_p0  ;;  %p208_p7 = scmp.lt.s32.totalorder %s1206_s27, 4 }
   0xe   : > { %p1292_p6 = por %p201_p3, %p45_p0  ;;  %s1208_s10 = smov [#allocation5]  }
   0xf   : > { %s1501_s30 = scalar_select %p1287_p4, 1, 0 }
  0x10   : > { %s1502_s8 = scalar_select %p1292_p6, 1, 0 }
  0x11   : > { %p1297_p8 = pnand %p792_p5, %p208_p7  ;;  %s220_s11 = sshll.u32 %s1208_s10, 4  ;;  %s221_s11 = int_to_ptr.vmem [resolvable:$true] %s220_s11 }
  0x12   : > { %s1209_s13 = smov [#allocation7]   ;;  %s1210_s15 = smov [#allocation8]  }
  0x13   : > { %s1503_s9 = scalar_select %p1297_p8, 1, 0 }
  0x14   : > { %p939_p9 = pneg %p1297_p8  ;;  %s236_s14 = sshll.u32 %s1209_s13, 4  ;;  %s237_s14 = int_to_ptr.vmem [resolvable:$true] %s236_s14 }
  0x15   : > { %s252_s16 = sshll.u32 %s1210_s15, 4  ;;  %s1039_s17 = scalar_lea.vmem %s221_s11, 1024  ;;  %s253_s16 = int_to_ptr.vmem [resolvable:$true] %s252_s16 }
  0x16   : > { %p1305_p10 = pnand %p939_p9, %p1495_p1  ;;  %p1040_p12 = scmp.ne.s32.totalorder %s221_s11, %s1039_s17 }
  0x17   : > { %p1047_p3 = scmp.lt.s32.totalorder %s221_s11, %s221_s11  ;;  %p1048_p5 = scmp.lt.s32.totalorder %s1039_s17, %s1039_s17 }
  0x18   : > { %p1030_p11 = pneg %p1305_p10 }
  0x19   : > { %p1049_p7 = por %p1048_p5, %p1047_p3 }
  0x1a   : > { %p1042_p13 = pnand %p1040_p12, %p1030_p11 }
  0x1c   : > { %p1043_p0 = pneg %p1042_p13 }
  0x1e   : > { %p1050_p9 = pnand %p1049_p7, %p1043_p0 }
  0x20   : > { %1053 = shalt.err (!%p1050_p9)
}
  0x21   : > { %s1211_s18 = smov 64   ;;  %s1212_s19 = smov 4  }
  0x22   : > { %s1505_s1 = sld [smem:[#allocation15_spill]]  ;;  %s1065_s22 = scalar_lea.vmem %s237_s14, 1024 }
  0x23   : > { %p1066_p1 = scmp.ne.s32.totalorder %s237_s14, %s1065_s22  ;;  %p1073_p2 = scmp.lt.s32.totalorder %s237_s14, %s237_s14 }
  0x24   : > { %p1074_p6 = scmp.lt.s32.totalorder %s1065_s22, %s1065_s22 }
  0x25   : > { %p1068_p12 = pnand %p1066_p1, %p1030_p11 }
  0x26   : > { %p1075_p3 = por %p1074_p6, %p1073_p2 }
  0x27   : > { %p1069_p13 = pneg %p1068_p12 }
  0x28   : > { %942 = dma.hbm_to_vmem [thread:$0]  (!%p1305_p10), %s1505_s1, 1024, %s221_s11, [#allocation6], %s1211_s18, %s1211_s18, %s1212_s19  }
  0x29   : > { %p1076_p0 = pnand %p1075_p3, %p1069_p13 }
  0x2b   : > { %1079 = shalt.err (!%p1076_p0)
}
  0x2c   : > { %s1506_s3 = sld [smem:[#allocation16_spill]]  ;;  %s1091_s10 = scalar_lea.vmem %s253_s16, 1024 }
  0x2d   : > { %p1092_p5 = scmp.ne.s32.totalorder %s253_s16, %s1091_s10  ;;  %p1099_p9 = scmp.lt.s32.totalorder %s253_s16, %s253_s16 }
  0x2e   : > { %p1100_p12 = scmp.lt.s32.totalorder %s1091_s10, %s1091_s10 }
  0x2f   : > { %p1094_p7 = pnand %p1092_p5, %p1030_p11 }
  0x30   : > { %p1101_p4 = por %p1100_p12, %p1099_p9 }
  0x31   : > { %p1095_p1 = pneg %p1094_p7 }
  0x32   : > { %945 = dma.hbm_to_vmem [thread:$0]  (!%p1305_p10), %s1506_s3, 1024, %s237_s14, [#allocation6], %s1211_s18, %s1211_s18, %s1212_s19  }
  0x33   : > { %p1102_p2 = pnand %p1101_p4, %p1095_p1 }
  0x35   : > { %1105 = shalt.err (!%p1102_p2)
}
  0x36   : > { %948 = dma.hbm_to_vmem [thread:$0]  (!%p1305_p10), %s1492_s5, 1024, %s253_s16, [#allocation9], %s1211_s18, %s1211_s18, %s1212_s19  }
  0x37   : > { %s1336_s14 = sadd.s32 1, %s1206_s27   ;;  %s32_s12 = sadd.s32 1, %s1202_s26 }
  0x38   : > { %s29_s15 = ssub.s32 %s1206_s27, %s1336_s14  ;;  %p39_p6 = scmp.ne.s32.totalorder %s1202_s26, %s1198_s25 }
  0x39   : > { %p30_p4 = scmp.eq.s32.totalorder %s29_s15, 0  ;;  %p40_p11 = scmp.eq.s32.totalorder %s1206_s27, 0 }
  0x3a   : > { %p960_p13 = scmp.lt.s32.totalorder %s1206_s27, 3  ;;  %p1507_p0 = scmp.eq.s32.totalorder %s1278_s28, 2 }
  0x3b   : > { %s1346_s17 = scalar_select %p30_p4, %s1202_s26, %s32_s12  }
  0x3c   : > { %p41_p3 = por %p40_p11, %p39_p6  ;;  %p1350_p5 = por %p1507_p0, %p39_p6 }
  0x3d   : > { %s269_s21 = sand.u32 1, %s1202_s26   ;;  %s798_s22 = sshll.u32 %s1206_s27, 6 }
  0x3e   : > { %s1508_s20 = scalar_select %p1350_p5, 1, 0 }
  0x3f   : > { %s797_s16 = sshll.u32 %s269_s21, 2  ;;  %s1359_s23 = scalar_lea.hbm %s1487_s0, %s798_s22 }
  0x40   : > { %s273_s29 = scalar_lea.vmem [#allocation2], %s797_s16  ;;  %p1361_p10 = pnand %p960_p13, %p41_p3 }
  0x41   : > { %s280_s10 = sshll.u32 %s273_s29, 4  ;;  %s270_s13 = scalar_lea.sflag [#allocation3], %s269_s21  ;;  %s281_s10 = int_to_ptr.vmem [resolvable:$true] %s280_s10 }
  0x42   : > { %s1106_s15 = scalar_lea.hbm %s1359_s23, 64  ;;  %p1108_p1 = pneg %p1361_p10 }
  0x43   : > { %p1107_p7 = scmp.ne.s32.totalorder %s1359_s23, %s1106_s15  ;;  %s1111_s18 = scalar_lea.hbm %s1487_s0, 192 }
  0x44   : > { %p1112_p2 = scmp.lt.s32.totalorder %s1359_s23, %s1487_s0  ;;  %p1113_p4 = scmp.lt.s32.totalorder %s1111_s18, %s1106_s15 }
  0x45   : > { %p1109_p9 = pnand %p1108_p1, %p1107_p7 }
  0x46   : > { %p1114_p6 = por %p1113_p4, %p1112_p2 }
  0x47   : > { %p1110_p12 = pneg %p1109_p9 }
  0x49   : > { %p1115_p11 = pnand %p1114_p6, %p1110_p12 }
  0x4b   : > { %1118 = shalt.err (!%p1115_p11)
}
  0x4c   : > { %s1119_s29 = scalar_lea.vmem %s281_s10, 64  ;;  %s1213_s21 = smov [#allocation2]  }
  0x4d   : > { %p1120_p13 = scmp.ne.s32.totalorder %s281_s10, %s1119_s29  ;;  %s1124_s1 = sshll.u32 %s1213_s21, 4  ;;  %s1125_s1 = int_to_ptr.vmem [resolvable:$false] %s1124_s1 }
  0x4e   : > { %s1126_s3 = scalar_lea.vmem %s1125_s1, 128  ;;  %p1127_p7 = scmp.lt.s32.totalorder %s281_s10, %s1125_s1 }
  0x4f   : > { %p1122_p3 = pnand %p1120_p13, %p1108_p1  ;;  %p1128_p9 = scmp.lt.s32.totalorder %s1126_s3, %s1119_s29 }
  0x51   : > { %p1123_p0 = pneg %p1122_p3  ;;  %p1129_p5 = por %p1128_p9, %p1127_p7 }
  0x53   : > { %p1130_p8 = pnand %p1129_p5, %p1123_p0 }
  0x55   : > { %1133 = shalt.err (!%p1130_p8)
}
  0x56   : > { %952 = dma.hbm_to_vmem [thread:$0]  (!%p1361_p10), %s1359_s23, 64, %s281_s10, %s270_s13  }
  0x57   : > { %p1510_p12 = scmp.ne.s32.totalorder %s1503_s9, 0 }
  0x58   : > { %s1382_s15 = sand.u32 (!%p1510_p12), 1, %s1198_s25   ;;  %p1511_p1 = scmp.ne.s32.totalorder (!%p1510_p12), %s1501_s30, 0 }
  0x59   : > { %289 = sbr.rel (%p1510_p12) target bundleno = 743 (0x2e7), region = 48  ;;  %s800_s12 = sshll.u32 (!%p1510_p12), %s1382_s15, 2 }
  0x5a   : > { %s292_s22 = scalar_lea.sflag (!%p1510_p12), [#allocation3], %s1382_s15  ;;  %s1386_s1 = scalar_lea.vmem (!%p1510_p12), [#allocation2], %s800_s12 }
  0x5e   : > { %1177 = dma.done.wait (%p1511_p1), %s292_s22, 64  }
  0x5f   : > { %1179 = vsyncadd (%p1511_p1), %s292_s22, 4294967232  ;;  %p1512_p8 = scmp.eq.s32.totalorder %s1278_s28, 0 }
  0x61   : > { %1181 = dma.done.wait (%p1512_p8), [#allocation6], 2048   ;;  %p1513_p5 = pmov %p1512_p8 }
  0x63   : > { %1183 = vsyncadd (%p1513_p5), [#allocation6], 4294965248  ;;  %p1514_p10 = pmov %p1513_p5 }
  0x64   : > { %p1515_p2 = pmov %p1513_p5 }
  0x65   : > { %1185 = dma.done.wait (%p1514_p10), [#allocation9], 1024  }
  0x66   : > { %1187 = vsyncadd (%p1515_p2), [#allocation9], 4294966272  ;;  %v1214_v0 = vmov 0.0   ;;  %vm1215_vm0 = vmmov 0   ;;  %v1004_v1 = vld [vmem:[#allocation5 + $0x38] sm:$0xff]   ;;  %v1005_v2 = vld [vmem:[#allocation5 + $0x30] sm:$0xff]  }
  0x67   : > { %863 = vmatprep.subr.bf16.mxu0 %v1214_v0  ;;  %879 = vmatprep.mubr.msk.bf16.mxu0 %vm1215_vm0, %v1214_v0  ;;  %v1006_v3 = vld [vmem:[#allocation5 + $0x28] sm:$0xff]   ;;  %v1012_v4 = vld [vmem:[#allocation7 + $0x38] sm:$0xff]   ;;  %v1007_v5 = vld [vmem:[#allocation5 + $0x20] sm:$0xff]   ;;  %s804_s10 = sshll.u32 %s1382_s15, 3  ;;  %s833_s18 = sshll.u32 %s1278_s28, 7 }
  0x68   : > { %883 = vmatprep.subr.bf16.mxu1 %v1214_v0  ;;  %899 = vmatprep.mubr.msk.bf16.mxu1 %vm1215_vm0, %v1214_v0  ;;  %v1013_v6 = vld [vmem:[#allocation7 + $0x30] sm:$0xff]   ;;  %v1008_v7 = vld [vmem:[#allocation5 + $0x18] sm:$0xff]   ;;  %v1014_v8 = vld [vmem:[#allocation7 + $0x28] sm:$0xff]   ;;  %s337_s19 = scalar_lea.vmem [#allocation10], %s804_s10  ;;  %s1445_s12 = scalar_lea.hbm %s1494_s7, %s833_s18 }
  0x69   : > { %864 = vmatpush3.bf16.msra.mxu0 %v1004_v1  ;;  %884 = vmatpush3.bf16.msra.mxu1 %v1012_v4  ;;  %v1009_v9 = vld [vmem:[#allocation5 + $0x10] sm:$0xff]   ;;  %v1015_v10 = vld [vmem:[#allocation7 + $0x20] sm:$0xff]   ;;  %v1010_v11 = vld [vmem:[#allocation5 + $0x8] sm:$0xff]   ;;  %s692_s16 = sshll.u32 %s337_s19, 4  ;;  %s679_s22 = scalar_lea.sflag [#allocation4], %s1382_s15  ;;  %s1447_s16 = int_to_ptr.vmem [resolvable:$true] %s692_s16 }
  0x6a   : > { %865 = vmatprep.subr.bf16.mxu0 %v1214_v0  ;;  %885 = vmatprep.subr.bf16.mxu1 %v1214_v0  ;;  %v1016_v12 = vld [vmem:[#allocation7 + $0x18] sm:$0xff]   ;;  %v1011_v13 = vld [vmem:[#allocation5] sm:$0xff]   ;;  %v1017_v14 = vld [vmem:[#allocation7 + $0x10] sm:$0xff]   ;;  %p1516_p6 = scmp.ne.s32.totalorder %s1508_s20, 0  ;;  %s1216_s28 = smov [#allocation10]  }
  0x6b   : > { %v339_v15 = vld [vmem:[%s1386_s1] sm:$0xf]  ;;  %v1018_v16 = vld [vmem:[#allocation7 + $0x8] sm:$0xff]   ;;  %v1019_v17 = vld [vmem:[#allocation7] sm:$0xff]   ;;  %s1134_s1 = scalar_lea.vmem %s1447_s16, 128  ;;  %s1138_s3 = sshll.u32 %s1216_s28, 4  ;;  %s1139_s3 = int_to_ptr.vmem [resolvable:$false] %s1138_s3 }
  0x6c   : > { %v1020_v18 = vld [vmem:[#allocation8 + $0x38] sm:$0xff]   ;;  %v1021_v19 = vld [vmem:[#allocation8 + $0x30] sm:$0xff]   ;;  %v1022_v20 = vld [vmem:[#allocation8 + $0x28] sm:$0xff]   ;;  %p1135_p4 = scmp.ne.s32.totalorder %s1447_s16, %s1134_s1  ;;  %s1140_s30 = scalar_lea.vmem %s1139_s3, 256 }
  0x6d   : > { %866 = vmatpush3.bf16.msra.mxu0 %v1005_v2  ;;  %886 = vmatpush3.bf16.msra.mxu1 %v1013_v6  ;;  %v1023_v21 = vld [vmem:[#allocation8 + $0x20] sm:$0xff]   ;;  %v1024_v22 = vld [vmem:[#allocation8 + $0x18] sm:$0xff]   ;;  %v1025_v23 = vld [vmem:[#allocation8 + $0x10] sm:$0xff]   ;;  %p1141_p3 = scmp.lt.s32.totalorder %s1447_s16, %s1139_s3  ;;  %p1142_p0 = scmp.lt.s32.totalorder %s1140_s30, %s1134_s1 }
  0x6e   : > { %867 = vmatprep.subr.bf16.mxu0 %v1214_v0  ;;  %887 = vmatprep.subr.bf16.mxu1 %v1214_v0  ;;  %v805_v24 = vld [vmem:[%s1489_s2] ss:$0 sm:$0xff]  ;;  %v1026_v32 = vld [vmem:[#allocation8 + $0x8] sm:$0xff]   ;;  %v1027_v33 = vld [vmem:[#allocation8] sm:$0xff]   ;;  %p1136_p11 = pnand %p1135_p4, %p1516_p6 }
  0x6f   : > { %v814_v34 = vld [vmem:[%s1491_s4] ss:$0 sm:$0xff]  ;;  %p1143_p7 = por %p1142_p0, %p1141_p3 }
  0x70   : > { %v823_v42 = vld [vmem:[%s1493_s6] ss:$0 sm:$0xff]  ;;  %p1137_p13 = pneg %p1136_p11 }
  0x71   : > { %868 = vmatpush3.bf16.msra.mxu0 %v1006_v3  ;;  %888 = vmatpush3.bf16.msra.mxu1 %v1014_v8 }
  0x72   : > { %869 = vmatprep.subr.bf16.mxu0 %v1214_v0  ;;  %889 = vmatprep.subr.bf16.mxu1 %v1214_v0  ;;  %p1144_p9 = pnand %p1143_p7, %p1137_p13 }
  0x75   : > { %870 = vmatpush3.bf16.msra.mxu0 %v1007_v5  ;;  %890 = vmatpush3.bf16.msra.mxu1 %v1015_v10 }
  0x76   : > { %871 = vmatprep.subr.bf16.mxu0 %v1214_v0  ;;  %891 = vmatprep.subr.bf16.mxu1 %v1214_v0 }
  0x79   : > { %872 = vmatpush3.bf16.msra.mxu0 %v1008_v7  ;;  %892 = vmatpush3.bf16.msra.mxu1 %v1016_v12 }
  0x7a   : > { %873 = vmatprep.subr.bf16.mxu0 %v1214_v0  ;;  %893 = vmatprep.subr.bf16.mxu1 %v1214_v0 }
  0x7d   : > { %874 = vmatpush3.bf16.msra.mxu0 %v1009_v9  ;;  %894 = vmatpush3.bf16.msra.mxu1 %v1017_v14 }
  0x7e   : > { %875 = vmatprep.subr.bf16.mxu0 %v1214_v0  ;;  %895 = vmatprep.subr.bf16.mxu1 %v1214_v0 }
  0x81   : > { %876 = vmatpush3.bf16.msra.mxu0 %v1010_v11  ;;  %896 = vmatpush3.bf16.msra.mxu1 %v1018_v16 }
  0x82   : > { %877 = vmatprep.subr.bf16.mxu0 %v1214_v0  ;;  %897 = vmatprep.subr.bf16.mxu1 %v1214_v0 }
  0x85   : > { %878 = vmatpush3.bf16.msra.mxu0 %v1011_v13  ;;  %898 = vmatpush3.bf16.msra.mxu1 %v1019_v17 }
  0x86   : > { %903 = vmatprep.subr.bf16.mxu0 %v1214_v0 }
  0x88   : > { %880 = vmatmul.mubr.bf16.vlgmr.msra.gmra.mxu0 %v339_v15 }
  0x89   : > { %919 = vmatprep.mubr.msk.bf16.mxu0 %vm1215_vm0, %v1214_v0  ;;  %904 = vmatpush3.bf16.msra.mxu0 %v1020_v18 }
  0x8a   : > { %905 = vmatprep.subr.bf16.mxu0 %v1214_v0 }
  0x8d   : > { %906 = vmatpush3.bf16.msra.mxu0 %v1021_v19 }
  0x8e   : > { %907 = vmatprep.subr.bf16.mxu0 %v1214_v0 }
  0x91   : > { %908 = vmatpush3.bf16.msra.mxu0 %v1022_v20 }
  0x92   : > { %909 = vmatprep.subr.bf16.mxu0 %v1214_v0 }
  0x95   : > { %910 = vmatpush3.bf16.msra.mxu0 %v1023_v21 }
  0x96   : > { %911 = vmatprep.subr.bf16.mxu0 %v1214_v0 }
  0x99   : > { %912 = vmatpush3.bf16.msra.mxu0 %v1024_v22 }
  0x9a   : > { %913 = vmatprep.subr.bf16.mxu0 %v1214_v0 }
  0x9d   : > { %914 = vmatpush3.bf16.msra.mxu0 %v1025_v23 }
  0x9e   : > { %915 = vmatprep.subr.bf16.mxu0 %v1214_v0 }
  0xa1   : > { %916 = vmatpush3.bf16.msra.mxu0 %v1026_v32 }
  0xa2   : > { %917 = vmatprep.subr.bf16.mxu0 %v1214_v0 }
  0xa5   : > { %918 = vmatpush3.bf16.msra.mxu0 %v1027_v33 }
 0x148   : > { %v445_v25 = vpop.f32.mrf.mxu0 }
 0x149   : > { %v446_v26 = vadd.f32 %v805_v24, %v445_v25 }
 0x14a   : > { %v881_v27 = vpop.f32.mrf.mxu0 }
 0x14b   : > { %v451_v28 = vmax.f32 %v446_v26, 0.0 }
 0x14c   : > { %v448_v29 = vpop.f32.mrf.mxu0 }
 0x14d   : > { %v452_v30 = vpack.c.bf16 %v451_v28, %v451_v28 }
 0x14e   : > { %v882_v31 = vpop.f32.mrf.mxu0 }
 0x14f   : > { %900 = vmatmul.mubr.bf16.vlgmr.msra.gmra.mxu1 %v452_v30 }
 0x20f   : > { %v558_v35 = vpop.f32.mrf.mxu1 }
 0x210   : > { %v559_v36 = vadd.f32 %v814_v34, %v558_v35 }
 0x211   : > { %v901_v37 = vpop.f32.mrf.mxu1 }
 0x212   : > { %v564_v38 = vmax.f32 %v559_v36, 0.0 }
 0x213   : > { %v561_v39 = vpop.f32.mrf.mxu1 }
 0x214   : > { %v565_v40 = vpack.c.bf16 %v564_v38, %v564_v38 }
 0x215   : > { %v902_v41 = vpop.f32.mrf.mxu1 }
 0x216   : > { %920 = vmatmul.mubr.bf16.vlgmr.msra.gmra.mxu0 %v565_v40 }
 0x2d6   : > { %v671_v43 = vpop.f32.mrf.mxu0 }
 0x2d7   : > { %v672_v44 = vadd.f32 %v823_v42, %v671_v43 }
 0x2d8   : > { %v921_v45 = vpop.f32.mrf.mxu0 }
 0x2d9   : > { %677 = vst [vmem:[%s337_s19] sm:$0xff] %v672_v44 }
 0x2da   : > { %v674_v46 = vpop.f32.mrf.mxu0 }
 0x2db   : > { %1147 = shalt.err (!%p1144_p9)
}
 0x2dc   : > { %s1148_s9 = scalar_lea.hbm %s1445_s12, 128  ;;  %s1152_s10 = scalar_lea.hbm %s1494_s7, 384 }
 0x2dd   : > { %p1149_p12 = scmp.ne.s32.totalorder %s1445_s12, %s1148_s9  ;;  %p1153_p5 = scmp.lt.s32.totalorder %s1445_s12, %s1494_s7 }
 0x2de   : > { %p1154_p10 = scmp.lt.s32.totalorder %s1152_s10, %s1148_s9 }
 0x2df   : > { %p1150_p1 = pnand %p1149_p12, %p1516_p6 }
 0x2e0   : > { %p1155_p2 = por %p1154_p10, %p1153_p5 }
 0x2e1   : > { %p1151_p8 = pneg %p1150_p1 }
 0x2e3   : > { %p1156_p4 = pnand %p1155_p2, %p1151_p8 }
 0x2e5   : > { %1159 = shalt.err (!%p1156_p4)
}
 0x2e6   : > { %937 = dma.vmem_to_hbm [thread:$0]  (%p1516_p6), %s1447_s16, 128, %s1445_s12, %s679_s22   ;;  %v922_v47 = vpop.f32.mrf.mxu0 }
 0x2e7 PF: > { %p964_p11 = scmp.ge.s32.totalorder %s1206_s27, 2  ;;  %s704_s18 = sand.u32 1, %s1194_s24  }
 0x2e8   : > { %p1517_p13 = scmp.ne.s32.totalorder %s1502_s8, 0  ;;  %s705_s19 = scalar_lea.sflag [#allocation4], %s704_s18 }
 0x2ea   : > { %p954_p3 = pnand %p964_p11, %p1517_p13 }
 0x2ec   : > { %p955_p0 = pneg %p954_p3 }
 0x2ee   : > { %1189 = dma.done.wait (%p955_p0), %s705_s19, 128  }
 0x2ef   : > { %1191 = vsyncadd (%p955_p0), %s705_s19, 4294967168  ;;  %p22_p7 = scmp.ge.s32.totalorder %s1336_s14, 5   ;;  %s1518_s24 = smov %s1198_s25 }
 0x2f0   : > { %s1519_s25 = smov %s1202_s26  ;;  %s1520_s26 = smov %s1346_s17 }
 0x2f1   : > { %s1521_s27 = smov %s1336_s14  ;;  %24 = sbr.rel (!%p22_p7) target bundleno = 10 (0xa), region = 105 }
 0x2f6   :  { %710 = vsyncpa [#allocation3], 1 }
 0x2f7   :  { %712 = vsyncpa [#allocation3 + $0x1], 1 }
 0x2f8   :  { %713 = vsyncpa [#allocation6], 1 }
 0x2f9   :  { %714 = vsyncpa [#allocation9], 1 }
 0x2fa   :  { %715 = vsyncpa [#allocation4], 1 }
 0x2fb   :  { %717 = vsyncpa [#allocation4 + $0x1], 1 }

</bundles_post_ra>
